<compile_context>
chip_gen: v6e
topology: v6e:2x2x1
jax: 0.10.0
libtpu: 0.0.40
codegen_flags: <defaults>
</compile_context>

<pallas_src>
import jax
import jax.numpy as jnp
from jax import lax
from jax.experimental import pallas as pl
from jax.experimental.pallas import tpu as pltpu


def mlp_kernel(x_ref, w1_ref, b1_ref, w2_ref, b2_ref, o_ref):
    # x: (tb, 10) native layout; weights in PyTorch nn.Linear (out, in) layout.
    #   h = relu(w1 @ x.T + b1) : (5, tb)   (transpose folded into the dot)
    #   y = w2 @ h + b2         : (2, tb)   (batch stays on the 128-lane axis)
    h = lax.dot_general(
        w1_ref[...], x_ref[...],
        dimension_numbers=(((1,), (1,)), ((), ())),
        preferred_element_type=jnp.float32)
    h = jnp.maximum(h + b1_ref[...], 0.0)
    y = jnp.dot(w2_ref[...], h, preferred_element_type=jnp.float32) + b2_ref[...]
    o_ref[...] = y.astype(o_ref.dtype)


_LANE = 128
_SMALL_BATCH_MAX = 2048   # grid-free path: whole x (<= ~1 MiB) resident in VMEM


def mymodel_forward(x, w1, b1, w2, b2, *, tb_cap=16384):
    """relu(x @ w1.T + b1) @ w2.T + b2  with PyTorch nn.Linear parameter layout.

    x: (B, 10)  w1: (5, 10)  b1: (5,)  w2: (2, 5)  b2: (2,)  ->  (B, 2)
    """
    B, d_in = x.shape
    d_hidden = w1.shape[0]
    d_out = w2.shape[0]

    b1c = b1.reshape(d_hidden, 1)
    b2c = b2.reshape(d_out, 1)
    out_shape = jax.ShapeDtypeStruct((d_out, B), x.dtype)

    if B <= _SMALL_BATCH_MAX:
        # Tiny problem: single block, no grid -> no per-step pipeline cost.
        out_t = pl.pallas_call(
            mlp_kernel,
            out_shape=out_shape,
            in_specs=[pl.BlockSpec(memory_space=pltpu.MemorySpace.VMEM)] * 5,
            out_specs=pl.BlockSpec(memory_space=pltpu.MemorySpace.VMEM),
        )(x, w1, b1c, w2, b2c)
    else:
        # Lane-aligned batch tile: large enough to amortise the ~0.35 us
        # per-step overhead, small enough that (a) there are always >= 2
        # balanced tiles (v7x megacore) and (b) the double-buffered
        # (tb, 128-lane-padded) x tile fits in scoped VMEM on every generation.
        tb_cap = max(_LANE, (tb_cap // _LANE) * _LANE)
        tb = min(tb_cap, pl.cdiv(pl.cdiv(B, 2), _LANE) * _LANE)
        n_tiles = pl.cdiv(B, tb)

        out_t = pl.pallas_call(
            mlp_kernel,
            out_shape=out_shape,
            grid=(n_tiles,),
            in_specs=[
                pl.BlockSpec((tb, d_in), lambda i: (i, 0)),         # x: batch tiles
                pl.BlockSpec((d_hidden, d_in), lambda i: (0, 0)),   # resident weights
                pl.BlockSpec((d_hidden, 1), lambda i: (0, 0)),      # resident bias
                pl.BlockSpec((d_out, d_hidden), lambda i: (0, 0)),
                pl.BlockSpec((d_out, 1), lambda i: (0, 0)),
            ],
            out_specs=pl.BlockSpec((d_out, tb), lambda i: (0, i)),
            compiler_params=pltpu.CompilerParams(
                # Megacore-shard the batch axis on v7x; no-op on v5e/v6e.
                dimension_semantics=("parallel",),
                # The (tb, 10) block is lane-padded to (tb, 128) in VMEM, so a
                # 16K tile is 8 MiB per buffer; raise the scoped limit so it
                # double-buffers on v5e (16 MiB default) while keeping large
                # headroom under v7x's 64 MiB physical VMEM.
                vmem_limit_bytes=40 * 1024 * 1024,
            ),
        )(x, w1, b1c, w2, b2c)

    # (2, B) -> (B, 2): only 8 B per batch element, a single tiny XLA op.
    return out_t.T


if __name__ == "__main__":
    key = jax.random.PRNGKey(0)
    k_w1, k_b1, k_w2, k_b2, k_x1, k_x2, k_x3 = jax.random.split(key, 7)

    d_in, d_hidden, d_out = 10, 5, 2

    # Parameters in PyTorch nn.Linear layout: weight (out, in), bias (out,).
    w1 = jax.random.normal(k_w1, (d_hidden, d_in), dtype=jnp.float32) * 0.3
    b1 = jax.random.normal(k_b1, (d_hidden,), dtype=jnp.float32) * 0.1
    w2 = jax.random.normal(k_w2, (d_out, d_hidden), dtype=jnp.float32) * 0.3
    b2 = jax.random.normal(k_b2, (d_out,), dtype=jnp.float32) * 0.1

    def ref_fn(xx):
        return jnp.maximum(xx @ w1.T + b1, 0.0) @ w2.T + b2

    # 1) Small batch: grid-free, fully VMEM-resident path.
    x1 = jax.random.normal(k_x1, (8, d_in), dtype=jnp.float32)
    o1 = jax.block_until_ready(mymodel_forward(x1, w1, b1, w2, b2))
    assert o1.shape == (8, d_out), o1.shape
    assert jnp.allclose(o1, ref_fn(x1), atol=1e-5, rtol=1e-5), \
        "small-batch mismatch vs reference"

    # 2) Gridded path with default tiling: 2 balanced tiles + ragged last tile.
    x2 = jax.random.normal(k_x2, (2500, d_in), dtype=jnp.float32)
    o2 = jax.block_until_ready(mymodel_forward(x2, w1, b1, w2, b2))
    assert o2.shape == (2500, d_out), o2.shape
    assert jnp.allclose(o2, ref_fn(x2), atol=1e-5, rtol=1e-5), \
        "two-tile gridded mismatch vs reference"

    # 3) Multi-tile gridded path (smaller cap to cheaply exercise >2 tiles
    #    and the masked ragged boundary).
    x3 = jax.random.normal(k_x3, (5000, d_in), dtype=jnp.float32)
    o3 = jax.block_until_ready(mymodel_forward(x3, w1, b1, w2, b2, tb_cap=1024))
    assert o3.shape == (5000, d_out), o3.shape
    assert jnp.allclose(o3, ref_fn(x3), atol=1e-5, rtol=1e-5), \
        "multi-tile gridded mismatch vs reference"

    print("KERNEL_OK")
</pallas_src>

<mosaic_0001>
module attributes {stable_mosaic.version = 11 : i64} {
  func.func @mlp_kernel(%arg0: memref<8x10xf32, #tpu.memory_space<vmem>>, %arg1: memref<5x10xf32, #tpu.memory_space<vmem>>, %arg2: memref<5x1xf32, #tpu.memory_space<vmem>>, %arg3: memref<2x5xf32, #tpu.memory_space<vmem>>, %arg4: memref<2x1xf32, #tpu.memory_space<vmem>>, %arg5: memref<2x8xf32, #tpu.memory_space<vmem>>) attributes {dimension_semantics = [], scalar_prefetch = 0 : i64, scratch_operands = 0 : i64, tpu.core_type = #tpu.core_type<tc>} {
    %c0 = arith.constant 0 : index
    %c0_0 = arith.constant 0 : index
    %0 = vector.load %arg1[%c0, %c0_0] : memref<5x10xf32, #tpu.memory_space<vmem>>, vector<5x10xf32>
    %c0_1 = arith.constant 0 : index
    %c0_2 = arith.constant 0 : index
    %1 = vector.load %arg0[%c0_1, %c0_2] : memref<8x10xf32, #tpu.memory_space<vmem>>, vector<8x10xf32>
    %cst = arith.constant dense<0.000000e+00> : vector<5x8xf32>
    %2 = tpu.matmul %0, %1, %cst {dimension_numbers = #tpu.dot_dimension_numbers<[1], [1], [0], [0], [0, 0, 1, 0], [], []>} : vector<5x10xf32>, vector<8x10xf32>, vector<5x8xf32> -> vector<5x8xf32>
    %c0_3 = arith.constant 0 : index
    %c0_4 = arith.constant 0 : index
    %3 = vector.load %arg2[%c0_3, %c0_4] : memref<5x1xf32, #tpu.memory_space<vmem>>, vector<5x1xf32>
    %4 = vector.broadcast %3 : vector<5x1xf32> to vector<5x8xf32>
    %5 = arith.addf %2, %4 : vector<5x8xf32>
    %cst_5 = arith.constant 0.000000e+00 : f32
    %6 = vector.broadcast %cst_5 : f32 to vector<5x8xf32>
    %7 = arith.maximumf %5, %6 : vector<5x8xf32>
    %c0_6 = arith.constant 0 : index
    %c0_7 = arith.constant 0 : index
    %8 = vector.load %arg3[%c0_6, %c0_7] : memref<2x5xf32, #tpu.memory_space<vmem>>, vector<2x5xf32>
    %cst_8 = arith.constant dense<0.000000e+00> : vector<2x8xf32>
    %9 = tpu.matmul %8, %7, %cst_8 {dimension_numbers = #tpu.dot_dimension_numbers<[1], [0], [0], [1], [0, 0, 1, 1], [], []>} : vector<2x5xf32>, vector<5x8xf32>, vector<2x8xf32> -> vector<2x8xf32>
    %c0_9 = arith.constant 0 : index
    %c0_10 = arith.constant 0 : index
    %10 = vector.load %arg4[%c0_9, %c0_10] : memref<2x1xf32, #tpu.memory_space<vmem>>, vector<2x1xf32>
    %11 = vector.broadcast %10 : vector<2x1xf32> to vector<2x8xf32>
    %12 = arith.addf %9, %11 : vector<2x8xf32>
    %c0_11 = arith.constant 0 : index
    %c0_12 = arith.constant 0 : index
    %13 = vector.load %arg5[%c0_11, %c0_12] : memref<2x8xf32, #tpu.memory_space<vmem>>, vector<2x8xf32>
    tpu.vector_store %arg5[%c0_11, %c0_12], %12 {strides = array<i32>} : memref<2x8xf32, #tpu.memory_space<vmem>>, vector<2x8xf32>,
    return
  }
}

</mosaic_0001>

<bundles_post_ra>
// kernel: tpu_custom_call.1
= control target key start
LH: loop header
LB: loop body
LE: loop exit
PB: predicated region body
PF: predicated region fallthrough
CT: control target
= control target key end

     0   :  { %10 = vsyncpa [#allocation3], 0  ;;  %s342_s0 = inlined_call_operand.vmem [shape: f32[8,10], index: 0, kind: input, shape index: {}]   ;;  %s343_s1 = inlined_call_operand.hbm [shape: f32[5,10], index: 1, kind: input, shape index: {}]   ;;  %s344_s2 = inlined_call_operand.vmem [shape: f32[5,1], index: 2, kind: input, shape index: {}]   ;;  %s345_s3 = inlined_call_operand.vmem [shape: f32[2,5], index: 3, kind: input, shape index: {}]   ;;  %s346_s4 = inlined_call_operand.vmem [shape: f32[2,1], index: 4, kind: input, shape index: {}]   ;;  %s347_s5 = inlined_call_operand.hbm [shape: f32[2,8], index: 5, kind: output, shape index: {}]  }
   0x1   :  { %11 = vsyncpa [#allocation4], 0  ;;  %s289_s18 = smov [#allocation2]  }
   0x2   :  { %s20_s19 = sshll.u32 %s289_s18, 4  ;;  %s21_s19 = int_to_ptr.vmem [resolvable:$true] %s20_s19 }
   0x3   :  { %s253_s20 = scalar_lea.vmem %s21_s19, 128  ;;  %p258_p1 = scmp.lt.s32.totalorder %s21_s19, %s21_s19 }
   0x4   :  { %p254_p0 = scmp.ne.s32.totalorder %s21_s19, %s253_s20  ;;  %p259_p2 = scmp.lt.s32.totalorder %s253_s20, %s253_s20 }
   0x6   :  { %p260_p3 = por %p259_p2, %p258_p1 }
   0x8   :  { %p261_p4 = pnand %p260_p3, %p254_p0 }
   0xa   :  { %264 = shalt.err (!%p261_p4)
}
   0xb   :  { %23 = dma.hbm_to_vmem [thread:$0]  %s343_s1, 128, %s21_s19, [#allocation3]  }
   0xc   :  { %285 = dma.done.wait [#allocation3], 128  }
   0xd   :  { %286 = vsyncadd [#allocation3], 4294967168  ;;  %v290_v0 = vmov 0.0   ;;  %vm291_vm0 = vmmov 0   ;;  %v292_v1 = vmov 0   ;;  %vm41_vm1 = vcmask 80896  }
   0xe   :  { %229 = vmatprep.subr.mxu0 %v290_v0  ;;  %231 = vmatprep.mubr.msk.f32.mxu0 %vm291_vm0, %v290_v0  ;;  %v34_v2 = vld [vmem:[%s342_s0] sm:$0xff]  ;;  %vm130_vm2 = vcmask 1044480   ;;  %vm126_vm3 = vcmask 39936   ;;  %vm204_vm4 = vcmask 58368  }
   0xf   :  { %244 = vset.pattern.permute.xlu0 %v292_v1  ;;  %234 = vmatprep.subr.mxu1 %v290_v0  ;;  %v35_v3 = vld [vmem:[%s344_s2] sm:$0x1f]  ;;  %s293_s2 = smov [#allocation5]  }
  0x10   :  { %236 = vmatprep.mubr.msk.f32.mxu1 %vm291_vm0, %v290_v0  ;;  %230 = vmatpush3.xpose.msk.msra.mxu0 %vm41_vm1, %v34_v2  ;;  %v33_v4 = vld [vmem:[#allocation2] sm:$0x1f]  ;;  %s212_s29 = sshll.u32 %s293_s2, 4  ;;  %s213_s29 = int_to_ptr.vmem [resolvable:$true] %s212_s29 }
  0x11   :  { %38 = vperm.xlu0 %244, %v35_v3   ;;  %v120_v5 = vld [vmem:[%s346_s4] sm:$0x3]  ;;  %s265_s4 = scalar_lea.vmem %s213_s29, 32  ;;  %p270_p6 = scmp.lt.s32.totalorder %s213_s29, %s213_s29 }
  0x12   :  { %v119_v11 = vld [vmem:[%s345_s3] sm:$0x3]  ;;  %p266_p5 = scmp.ne.s32.totalorder %s213_s29, %s265_s4  ;;  %p271_p7 = scmp.lt.s32.totalorder %s265_s4, %s265_s4 }
  0x13   :  { %232 = vmatmul.mubr.msk.f32.vlgmr.msra.gmra.mxu0 %vm41_vm1, %v33_v4 }
  0x14   :  { %p272_p8 = por %p271_p7, %p270_p6 }
  0x15   :  { %123 = vperm.xlu0 %244, %v120_v5  }
  0x16   :  { %p273_p9 = pnand %p272_p8, %p266_p5 }
  0x8c   :  { %v39_v6 = vpop.permute.xlu0 %38 }
  0x90   :  { %v124_v12 = vpop.permute.xlu0 %123 }
  0xd3   :  { %v114_v7 = vpop.f32.mrf.mxu0 }
  0xd4   :  { %v115_v8 = vadd.f32 %v114_v7, %v39_v6 }
  0xd5   :  { %v233_v9 = vpop.f32.mrf.mxu0 }
  0xd6   :  { %v118_v10 = vmax.f32 %v115_v8, 0.0 }
  0xd8   :  { %235 = vmatpush3.msk.msra.mxu1 %vm130_vm2, %v118_v10 }
  0xd9   :  { %237 = vmatmul.mubr.msk.f32.vlgmr.msra.gmra.mxu1 %vm126_vm3, %v119_v11 }
 0x199   :  { %v200_v13 = vpop.f32.mrf.mxu1 }
 0x19a   :  { %v201_v14 = vadd.f32 %v200_v13, %v124_v12 }
 0x19b   :  { %v238_v15 = vpop.f32.mrf.mxu1 }
 0x19c   :  { %205 = vst.msk [vmem:[#allocation5] sm:$0x3] %vm204_vm4, %v201_v14 }
 0x19d   :  { %276 = shalt.err (!%p273_p9)
}
 0x19e   :  { %215 = dma.vmem_to_hbm [thread:$0]  %s213_s29, 32, %s347_s5, [#allocation4]  }
 0x19f   :  { %287 = dma.done.wait [#allocation4], 32  }
 0x1a0   :  { %288 = vsyncadd [#allocation4], 4294967264 }
 0x1a1   :  { %219 = vsyncpa [#allocation3], 1 }
 0x1a2   :  { %220 = vsyncpa [#allocation4], 1 }

</bundles_post_ra>
